<compile_context>
chip_gen: v7x
topology: tpu7x:2x2x1
jax: 0.10.0
libtpu: 0.0.40
codegen_flags: <defaults>
</compile_context>

<pallas_src>
import jax
import jax.numpy as jnp
from jax.experimental import pallas as pl
from jax.experimental.pallas import tpu as pltpu


# ----------------------------- helpers ---------------------------------------

def _row_tile(rows, pref=512):
    """Pick a row tile that divides `rows` (full array if nothing divides)."""
    for t in (pref, 256, 128, 64, 32, 16, 8):
        if rows >= t and rows % t == 0:
            return t
    return rows


# ------- preamble: latents init + all AdaLN shift/scale embeddings -----------

def preamble_pallas(t2, ta_w, ta_b, latents_param, ln_w, ln_b):
    """t2: (B, Tdim).  Returns (latents0 (B,N,D), ada_flat (B, layers*6*D))."""
    B, _ = t2.shape
    N, D = latents_param.shape
    LW = ln_w.shape[1]

    def kernel(t_ref, taw_ref, tab_ref, lat_ref, lnw_ref, lnb_ref,
               lat_o_ref, ada_o_ref):
        ts = jax.nn.silu(t_ref[...])                                   # (B, Tdim)
        tl = jnp.dot(ts, taw_ref[...],
                     preferred_element_type=jnp.float32) + tab_ref[...]  # (B, D)
        lat_o_ref[...] = lat_ref[...] + tl[:, None, :]                 # (B, N, D)
        ada_o_ref[...] = jnp.dot(ts, lnw_ref[...],
                                 preferred_element_type=jnp.float32) + lnb_ref[...]

    return pl.pallas_call(
        kernel,
        out_shape=(jax.ShapeDtypeStruct((B, N, D), jnp.float32),
                   jax.ShapeDtypeStruct((B, LW), jnp.float32)),
    )(t2, ta_w, ta_b, latents_param, ln_w, ln_b)


# ------------- proj_in: Linear fused with no-affine LayerNorm(x) -------------

def proj_in_ln_pallas(x, w_bf16, b):
    B, S, din = x.shape
    D = w_bf16.shape[1]
    rows = B * S
    tr = _row_tile(rows)
    x2 = x.reshape(rows, din)

    def kernel(x_ref, w_ref, b_ref, o_ref):
        y = jnp.dot(x_ref[...].astype(jnp.bfloat16), w_ref[...],
                    preferred_element_type=jnp.float32) + b_ref[...]
        mu = jnp.mean(y, axis=-1, keepdims=True)
        var = jnp.mean(jnp.square(y - mu), axis=-1, keepdims=True)
        o_ref[...] = (y - mu) * jax.lax.rsqrt(var + 1e-6)   # LN eps=1e-6, no affine

    out = pl.pallas_call(
        kernel,
        out_shape=jax.ShapeDtypeStruct((rows, D), jnp.float32),
        grid=(rows // tr,),
        in_specs=[pl.BlockSpec((tr, din), lambda i: (i, 0)),
                  pl.BlockSpec(w_bf16.shape, lambda i: (0, 0)),
                  pl.BlockSpec(b.shape, lambda i: (0, 0))],
        out_specs=pl.BlockSpec((tr, D), lambda i: (i, 0)),
        compiler_params=pltpu.CompilerParams(dimension_semantics=("parallel",)),
    )(x2, w_bf16, b)
    return out.reshape(B, S, D)


# -------------------- fused stack of PerceiverAttentionBlocks ----------------

def make_stack_kernel(D, H):
    hd = D // H

    def kernel(lat0_ref, xh_ref, ada_ref,
               wq_ref, wk_ref, wv_ref, bq_ref, bk_ref, bv_ref,
               wo_ref, bo_ref, wfc_ref, bfc_ref, wpj_ref, bpj_ref,
               o_ref, acc_ref):
        l = pl.program_id(1)

        @pl.when(l == 0)
        def _():
            acc_ref[...] = lat0_ref[0]          # load initial latents once / batch

        lat = acc_ref[...]                       # (N, D) resident across layers
        x_hat = xh_ref[0]                        # (S, D)  pre-LayerNormed context
        ada = ada_ref[0, 0]                      # (3, 2D) [ln1 | ln2 | ln_ff]

        def modulate(v_hat, idx):
            shift = ada[idx, :D][None, :]
            sc = ada[idx, D:][None, :]
            return v_hat * (1.0 + sc) + shift

        def ln(v):                               # no-affine LN, eps=1e-6
            mu = jnp.mean(v, axis=-1, keepdims=True)
            var = jnp.mean(jnp.square(v - mu), axis=-1, keepdims=True)
            return (v - mu) * jax.lax.rsqrt(var + 1e-6)

        nl = modulate(ln(lat), 0)                # AdaLN(latents)          (N, D)
        nx = modulate(x_hat, 1)                  # AdaLN(x): scale/shift only (S, D)
        kv = jnp.concatenate([nl, nx], axis=0)   # (N+S, D)

        N = lat.shape[0]
        M = kv.shape[0]

        # qkv projections (1/sqrt(hd) is folded into wq/bq at prep time)
        q = jnp.dot(nl.astype(jnp.bfloat16), wq_ref[0],
                    preferred_element_type=jnp.float32) + bq_ref[0]
        k = jnp.dot(kv.astype(jnp.bfloat16), wk_ref[0],
                    preferred_element_type=jnp.float32) + bk_ref[0]
        v = jnp.dot(kv.astype(jnp.bfloat16), wv_ref[0],
                    preferred_element_type=jnp.float32) + bv_ref[0]

        # head-batched attention (no per-head Python loop / lane concat)
        qh = q.reshape(N, H, hd).transpose(1, 0, 2)   # (H, N, hd)
        kh = k.reshape(M, H, hd).transpose(1, 0, 2)   # (H, M, hd)
        vh = v.reshape(M, H, hd).transpose(1, 0, 2)   # (H, M, hd)

        s = jnp.einsum("hqd,hkd->hqk", qh, kh,
                       preferred_element_type=jnp.float32)       # (H, N, M)
        s = s - jnp.max(s, axis=-1, keepdims=True)
        p = jnp.exp(s)
        p = p * pl.reciprocal(jnp.sum(p, axis=-1, keepdims=True), approx=True)
        ao = jnp.einsum("hqk,hkd->hqd", p, vh,
                        preferred_element_type=jnp.float32)      # (H, N, hd)
        attn = ao.transpose(1, 0, 2).reshape(N, D)
        attn = jnp.dot(attn.astype(jnp.bfloat16), wo_ref[0],
                       preferred_element_type=jnp.float32) + bo_ref[0]

        lat = lat + attn                          # residual 1

        ff_in = modulate(ln(lat), 2)
        h1 = jnp.dot(ff_in.astype(jnp.bfloat16), wfc_ref[0],
                     preferred_element_type=jnp.float32) + bfc_ref[0]
        h1 = jnp.square(jnp.maximum(h1, 0.0))     # SquaredReLU
        mlp = jnp.dot(h1.astype(jnp.bfloat16), wpj_ref[0],
                      preferred_element_type=jnp.float32) + bpj_ref[0]
        lat = lat + mlp                           # residual 2

        acc_ref[...] = lat

        @pl.when(l == pl.num_programs(1) - 1)
        def _():
            o_ref[0] = lat                        # single HBM writeback per batch

    return kernel


def perceiver_stack_pallas(x_hat, latents0, ada, w, heads):
    B, S, D = x_hat.shape
    N = latents0.shape[1]
    L = ada.shape[1]

    weight_names = ["wq", "wk", "wv", "bq", "bk", "bv",
                    "wo", "bo", "wfc", "bfc", "wpj", "bpj"]
    weights = [w[n] for n in weight_names]
    # all stacked weights are 3-D: (layers, rows, cols) -> block (1, rows, cols)
    w_specs = [pl.BlockSpec((1,) + a.shape[1:], lambda b, l: (l, 0, 0))
               for a in weights]

    return pl.pallas_call(
        make_stack_kernel(D, heads),
        out_shape=jax.ShapeDtypeStruct((B, N, D), jnp.float32),
        grid=(B, L),
        in_specs=[pl.BlockSpec((1, N, D), lambda b, l: (b, 0, 0)),
                  pl.BlockSpec((1, S, D), lambda b, l: (b, 0, 0)),
                  pl.BlockSpec((1, 1, 3, 2 * D), lambda b, l: (b, l, 0, 0))]
                 + w_specs,
        out_specs=pl.BlockSpec((1, N, D), lambda b, l: (b, 0, 0)),
        scratch_shapes=[pltpu.VMEM((N, D), jnp.float32)],   # resident latents
        compiler_params=pltpu.CompilerParams(
            dimension_semantics=("parallel", "arbitrary"),
            vmem_limit_bytes=48 * 1024 * 1024),
    )(latents0, x_hat, ada, *weights)


# ----------------------- proj_out: Linear + LayerNorm ------------------------

def proj_out_pallas(x, w_bf16, b, gamma, beta):
    B, N, D = x.shape
    dout = w_bf16.shape[1]
    rows = B * N
    tr = _row_tile(rows)
    x2 = x.reshape(rows, D)

    # Note: output_dim (48) < 128 lanes -> partial stores; pad to 128 outside if
    # this ever becomes the bottleneck at production shapes.
    def kernel(x_ref, w_ref, b_ref, g_ref, be_ref, o_ref):
        y = jnp.dot(x_ref[...].astype(jnp.bfloat16), w_ref[...],
                    preferred_element_type=jnp.float32) + b_ref[...]
        mu = jnp.mean(y, axis=-1, keepdims=True)
        var = jnp.mean(jnp.square(y - mu), axis=-1, keepdims=True)
        yn = (y - mu) * jax.lax.rsqrt(var + 1e-5)          # torch LN default eps
        o_ref[...] = yn * g_ref[...] + be_ref[...]

    out = pl.pallas_call(
        kernel,
        out_shape=jax.ShapeDtypeStruct((rows, dout), jnp.float32),
        grid=(rows // tr,),
        in_specs=[pl.BlockSpec((tr, D), lambda i: (i, 0)),
                  pl.BlockSpec(w_bf16.shape, lambda i: (0, 0)),
                  pl.BlockSpec(b.shape, lambda i: (0, 0)),
                  pl.BlockSpec(gamma.shape, lambda i: (0, 0)),
                  pl.BlockSpec(beta.shape, lambda i: (0, 0))],
        out_specs=pl.BlockSpec((tr, dout), lambda i: (i, 0)),
        compiler_params=pltpu.CompilerParams(dimension_semantics=("parallel",)),
    )(x2, w_bf16, b, gamma, beta)
    return out.reshape(B, N, dout)


# ------------------------------- parameters ----------------------------------

def init_params(key, *, width, layers, num_latents, output_dim, input_dim, time_dim):
    def nrm(k, shape, scl=0.02):
        return scl * jax.random.normal(k, shape, dtype=jnp.float32)

    keys = iter(jax.random.split(key, 7 + layers * 18))
    params = {
        "latents": (width ** -0.5) * jax.random.normal(next(keys), (num_latents, width),
                                                       dtype=jnp.float32),
        "ta_w": nrm(next(keys), (time_dim, width)),
        "ta_b": nrm(next(keys), (1, width)),
        "in_w": nrm(next(keys), (input_dim, width)),
        "in_b": nrm(next(keys), (1, width)),
        "out_w": nrm(next(keys), (width, output_dim)),
        "out_b": nrm(next(keys), (1, output_dim)),
        "out_gamma": jnp.ones((1, output_dim), jnp.float32),
        "out_beta": jnp.zeros((1, output_dim), jnp.float32),
        "blocks": [],
    }
    for _ in range(layers):
        blk = {
            # NOTE: the torch module zero-inits the AdaLayerNorm linears; they are
            # randomized here (deterministically) so the scale/shift path is exercised.
            "ln1_w": nrm(next(keys), (time_dim, 2 * width)),
            "ln1_b": nrm(next(keys), (1, 2 * width)),
            "ln2_w": nrm(next(keys), (time_dim, 2 * width)),
            "ln2_b": nrm(next(keys), (1, 2 * width)),
            "lnff_w": nrm(next(keys), (time_dim, 2 * width)),
            "lnff_b": nrm(next(keys), (1, 2 * width)),
            "wq": nrm(next(keys), (width, width)),
            "wk": nrm(next(keys), (width, width)),
            "wv": nrm(next(keys), (width, width)),
            "bq": nrm(next(keys), (1, width)),
            "bk": nrm(next(keys), (1, width)),
            "bv": nrm(next(keys), (1, width)),
            "wo": nrm(next(keys), (width, width)),
            "bo": nrm(next(keys), (1, width)),
            "wfc": nrm(next(keys), (width, 4 * width)),
            "bfc": nrm(next(keys), (1, 4 * width)),
            "wpj": nrm(next(keys), (4 * width, width)),
            "bpj": nrm(next(keys), (1, width)),
        }
        params["blocks"].append(blk)
    return params


def prepare_weights(params, heads):
    """Stack per-layer weights, fold 1/sqrt(hd) into wq/bq, cast matmul weights to bf16."""
    blocks = params["blocks"]
    D = params["latents"].shape[1]
    hd = D // heads
    scale = float(hd) ** -0.5

    # all-layer AdaLN conditioning weights: (Tdim, layers*6*D) in [ln1|ln2|ln_ff] order
    ln_w = jnp.concatenate(
        [jnp.concatenate([b["ln1_w"], b["ln2_w"], b["lnff_w"]], axis=1) for b in blocks],
        axis=1)
    ln_b = jnp.concatenate(
        [jnp.concatenate([b["ln1_b"], b["ln2_b"], b["lnff_b"]], axis=1) for b in blocks],
        axis=1)

    def stack(name, *, bf16=False, mul=None):
        a = jnp.stack([b[name] for b in blocks], axis=0)
        if mul is not None:
            a = a * mul
        return a.astype(jnp.bfloat16) if bf16 else a

    return {
        "latents": params["latents"],
        "ta_w": params["ta_w"], "ta_b": params["ta_b"],
        "ln_w": ln_w, "ln_b": ln_b,
        "wq": stack("wq", bf16=True, mul=scale), "bq": stack("bq", mul=scale),
        "wk": stack("wk", bf16=True), "bk": stack("bk"),
        "wv": stack("wv", bf16=True), "bv": stack("bv"),
        "wo": stack("wo", bf16=True), "bo": stack("bo"),
        "wfc": stack("wfc", bf16=True), "bfc": stack("bfc"),
        "wpj": stack("wpj", bf16=True), "bpj": stack("bpj"),
        "in_w": params["in_w"].astype(jnp.bfloat16), "in_b": params["in_b"],
        "out_w": params["out_w"].astype(jnp.bfloat16), "out_b": params["out_b"],
        "out_gamma": params["out_gamma"], "out_beta": params["out_beta"],
    }


# --------------------------------- forward -----------------------------------

def perceiver_resampler_forward(x, t_emb, prep, heads):
    B = x.shape[0]
    D = prep["latents"].shape[1]
    L = prep["wq"].shape[0]

    t2 = t_emb.reshape(B, -1)
    latents0, ada_flat = preamble_pallas(
        t2, prep["ta_w"], prep["ta_b"], prep["latents"], prep["ln_w"], prep["ln_b"])
    ada = ada_flat.reshape(B, L, 3, 2 * D)        # metadata-only reshape

    # proj_in + the (block-invariant) no-affine LayerNorm of x, fused.
    x_hat = proj_in_ln_pallas(x, prep["in_w"], prep["in_b"])

    # all PerceiverAttentionBlocks in one pallas_call, latents resident in VMEM.
    latents = perceiver_stack_pallas(x_hat, latents0, ada, prep, heads)

    # proj_out: Linear + LayerNorm(affine).
    return proj_out_pallas(latents, prep["out_w"], prep["out_b"],
                           prep["out_gamma"], prep["out_beta"])


if __name__ == "__main__":
    B, S = 2, 16
    width, layers, heads = 64, 2, 4
    num_latents, input_dim, time_dim, output_dim = 16, 32, 32, 48

    root = jax.random.PRNGKey(0)
    kx, kt, kp = jax.random.split(root, 3)
    x = jax.random.normal(kx, (B, S, input_dim), dtype=jnp.float32)
    t_emb = jax.random.normal(kt, (B, 1, time_dim), dtype=jnp.float32)

    params = init_params(kp, width=width, layers=layers, num_latents=num_latents,
                         output_dim=output_dim, input_dim=input_dim, time_dim=time_dim)
    prep = prepare_weights(params, heads)

    out = perceiver_resampler_forward(x, t_emb, prep, heads)
    out = jax.block_until_ready(out)
    assert out.shape == (B, num_latents, output_dim), out.shape
    assert bool(jnp.all(jnp.isfinite(out)))
    print("KERNEL_OK")
</pallas_src>

<mosaic_0001>
module attributes {stable_mosaic.version = 11 : i64} {
  func.func @kernel(%arg0: memref<2x32xf32, #tpu.memory_space<vmem>>, %arg1: memref<32x64xf32, #tpu.memory_space<vmem>>, %arg2: memref<1x64xf32, #tpu.memory_space<vmem>>, %arg3: memref<16x64xf32, #tpu.memory_space<vmem>>, %arg4: memref<32x768xf32, #tpu.memory_space<vmem>>, %arg5: memref<1x768xf32, #tpu.memory_space<vmem>>, %arg6: memref<2x16x64xf32, #tpu.memory_space<vmem>>, %arg7: memref<2x768xf32, #tpu.memory_space<vmem>>) attributes {dimension_semantics = [], scalar_prefetch = 0 : i64, scratch_operands = 0 : i64, tpu.core_type = #tpu.core_type<tc>} {
    %c0 = arith.constant 0 : index
    %c0_0 = arith.constant 0 : index
    %0 = vector.load %arg0[%c0, %c0_0] : memref<2x32xf32, #tpu.memory_space<vmem>>, vector<2x32xf32>
    %1 = arith.negf %0 : vector<2x32xf32>
    %2 = math.exp %1 : vector<2x32xf32>
    %cst = arith.constant 1.000000e+00 : f32
    %3 = vector.broadcast %cst : f32 to vector<2x32xf32>
    %4 = arith.addf %3, %2 : vector<2x32xf32>
    %5 = arith.divf %3, %4 : vector<2x32xf32>
    %6 = arith.mulf %0, %5 : vector<2x32xf32>
    %c0_1 = arith.constant 0 : index
    %c0_2 = arith.constant 0 : index
    %7 = vector.load %arg1[%c0_1, %c0_2] : memref<32x64xf32, #tpu.memory_space<vmem>>, vector<32x64xf32>
    %cst_3 = arith.constant dense<0.000000e+00> : vector<2x64xf32>
    %8 = tpu.matmul %6, %7, %cst_3 {dimension_numbers = #tpu.dot_dimension_numbers<[1], [0], [0], [1], [0, 0, 1, 1], [], []>} : vector<2x32xf32>, vector<32x64xf32>, vector<2x64xf32> -> vector<2x64xf32>
    %c0_4 = arith.constant 0 : index
    %c0_5 = arith.constant 0 : index
    %9 = vector.load %arg2[%c0_4, %c0_5] : memref<1x64xf32, #tpu.memory_space<vmem>>, vector<1x64xf32>
    %10 = vector.broadcast %9 : vector<1x64xf32> to vector<2x64xf32>
    %11 = arith.addf %8, %10 : vector<2x64xf32>
    %c0_6 = arith.constant 0 : index
    %c0_7 = arith.constant 0 : index
    %12 = vector.load %arg3[%c0_6, %c0_7] : memref<16x64xf32, #tpu.memory_space<vmem>>, vector<16x64xf32>
    %13 = vector.shape_cast %11 : vector<2x64xf32> to vector<2x1x64xf32>
    %14 = vector.shape_cast %12 : vector<16x64xf32> to vector<1x16x64xf32>
    %15 = vector.broadcast %14 : vector<1x16x64xf32> to vector<2x16x64xf32>
    %16 = vector.broadcast %13 : vector<2x1x64xf32> to vector<2x16x64xf32>
    %17 = arith.addf %15, %16 : vector<2x16x64xf32>
    %c0_8 = arith.constant 0 : index
    %c0_9 = arith.constant 0 : index
    %c0_10 = arith.constant 0 : index
    %18 = vector.load %arg6[%c0_8, %c0_9, %c0_10] : memref<2x16x64xf32, #tpu.memory_space<vmem>>, vector<2x16x64xf32>
    tpu.vector_store %arg6[%c0_8, %c0_9, %c0_10], %17 {strides = array<i32>} : memref<2x16x64xf32, #tpu.memory_space<vmem>>, vector<2x16x64xf32>,
    %c0_11 = arith.constant 0 : index
    %c0_12 = arith.constant 0 : index
    %19 = vector.load %arg4[%c0_11, %c0_12] : memref<32x768xf32, #tpu.memory_space<vmem>>, vector<32x768xf32>
    %cst_13 = arith.constant dense<0.000000e+00> : vector<2x768xf32>
    %20 = tpu.matmul %6, %19, %cst_13 {dimension_numbers = #tpu.dot_dimension_numbers<[1], [0], [0], [1], [0, 0, 1, 1], [], []>} : vector<2x32xf32>, vector<32x768xf32>, vector<2x768xf32> -> vector<2x768xf32>
    %c0_14 = arith.constant 0 : index
    %c0_15 = arith.constant 0 : index
    %21 = vector.load %arg5[%c0_14, %c0_15] : memref<1x768xf32, #tpu.memory_space<vmem>>, vector<1x768xf32>
    %22 = vector.broadcast %21 : vector<1x768xf32> to vector<2x768xf32>
    %23 = arith.addf %20, %22 : vector<2x768xf32>
    %c0_16 = arith.constant 0 : index
    %c0_17 = arith.constant 0 : index
    %24 = vector.load %arg7[%c0_16, %c0_17] : memref<2x768xf32, #tpu.memory_space<vmem>>, vector<2x768xf32>
    tpu.vector_store %arg7[%c0_16, %c0_17], %23 {strides = array<i32>} : memref<2x768xf32, #tpu.memory_space<vmem>>, vector<2x768xf32>,
    return
  }
}

</mosaic_0001>

<bundles_post_ra>
// kernel: tpu_custom_call.1
= control target key start
LH: loop header
LB: loop body
LE: loop exit
PB: predicated region body
PF: predicated region fallthrough
CT: control target
= control target key end

     0   :  { %13 = vsyncpa [#allocation3], 0  ;;  %s922_s0 = inlined_call_operand.hbm [shape: f32[2,32], index: 0, kind: input, shape index: {}]   ;;  %s923_s1 = inlined_call_operand.hbm [shape: f32[32,64], index: 1, kind: input, shape index: {}]   ;;  %s924_s2 = inlined_call_operand.vmem [shape: f32[1,64], index: 2, kind: input, shape index: {}]   ;;  %s925_s3 = inlined_call_operand.hbm [shape: f32[16,64], index: 3, kind: input, shape index: {}]   ;;  %s926_s4 = inlined_call_operand.hbm [shape: f32[32,768], index: 4, kind: input, shape index: {}]   ;;  %s927_s5 = inlined_call_operand.vmem [shape: f32[1,768], index: 5, kind: input, shape index: {}]   ;;  %s928_s6 = inlined_call_operand.hbm [shape: f32[2,16,64], index: 6, kind: output, shape index: {0}]   ;;  %s929_s7 = inlined_call_operand.hbm [shape: f32[2,768], index: 7, kind: output, shape index: {1}]  }
   0x1   :  { %14 = vsyncpa [#allocation6], 0 }
   0x2   :  { %15 = vsyncpa [#allocation9], 0 }
   0x3   :  { %16 = vsyncpa [#allocation4], 0 }
   0x4   :  { %17 = vsyncpa [#allocation12], 0  ;;  %s768_s24 = smov [#allocation5]   ;;  %s626_s28 = scalar_lea.hbm %s923_s1, 512 }
   0x5   :  { %s33_s25 = sshll.u32 %s768_s24, 4  ;;  %p627_p0 = scmp.ne.s32.totalorder %s923_s1, %s626_s28  ;;  %s34_s25 = int_to_ptr.vmem [resolvable:$true] %s33_s25 }
   0x6   :  { %p630_p1 = scmp.lt.u32.totalorder %s626_s28, %s923_s1 }
   0x8   :  { %p632_p2 = pnand %p630_p1, %p627_p0 }
   0xa   :  { %635 = shalt.err (!%p632_p2)
}
   0xb   :  { %s636_s10 = scalar_lea.vmem %s34_s25, 512  ;;  %p641_p4 = scmp.lt.s32.totalorder %s34_s25, %s34_s25 }
   0xc   :  { %p637_p3 = scmp.ne.s32.totalorder %s34_s25, %s636_s10  ;;  %p642_p5 = scmp.lt.s32.totalorder %s636_s10, %s636_s10 }
   0xe   :  { %p643_p6 = por %p642_p5, %p641_p4 }
  0x10   :  { %p644_p7 = pnand %p643_p6, %p637_p3 }
  0x12   :  { %647 = shalt.err (!%p644_p7)
}
  0x13   :  { %s769_s11 = smov 128   ;;  %s770_s12 = smov 8  }
  0x14   :  { %39 = dma.hbm_to_vmem [thread:$0]  %s923_s1, 512, %s34_s25, [#allocation6], %s769_s11, %s769_s11, %s770_s12  }
  0x15   :  { %s771_s15 = smov [#allocation2]   ;;  %s772_s17 = smov [#allocation7]  }
  0x16   :  { %s24_s16 = sshll.u32 %s771_s15, 4  ;;  %s47_s18 = sshll.u32 %s772_s17, 4  ;;  %s25_s16 = int_to_ptr.vmem [resolvable:$true] %s24_s16  ;;  %s48_s18 = int_to_ptr.vmem [resolvable:$true] %s47_s18 }
  0x17   :  { %s648_s21 = scalar_lea.hbm %s922_s0, 32 }
  0x18   :  { %p649_p8 = scmp.ne.s32.totalorder %s922_s0, %s648_s21  ;;  %p652_p9 = scmp.lt.u32.totalorder %s648_s21, %s922_s0 }
  0x1a   :  { %p654_p10 = pnand %p652_p9, %p649_p8 }
  0x1c   :  { %657 = shalt.err (!%p654_p10)
}
  0x1d   :  { %s658_s1 = scalar_lea.vmem %s25_s16, 32  ;;  %p663_p12 = scmp.lt.s32.totalorder %s25_s16, %s25_s16 }
  0x1e   :  { %p659_p11 = scmp.ne.s32.totalorder %s25_s16, %s658_s1  ;;  %p664_p13 = scmp.lt.s32.totalorder %s658_s1, %s658_s1 }
  0x20   :  { %p665_p0 = por %p664_p13, %p663_p12 }
  0x22   :  { %p666_p1 = pnand %p665_p0, %p659_p11 }
  0x24   :  { %669 = shalt.err (!%p666_p1)
}
  0x25   :  { %27 = dma.hbm_to_vmem [thread:$0]  %s922_s0, 32, %s25_s16, [#allocation3]  }
  0x26   :  { %s670_s30 = scalar_lea.hbm %s925_s3, 256 }
  0x27   :  { %p671_p2 = scmp.ne.s32.totalorder %s925_s3, %s670_s30  ;;  %p674_p3 = scmp.lt.u32.totalorder %s670_s30, %s925_s3 }
  0x29   :  { %p676_p4 = pnand %p674_p3, %p671_p2 }
  0x2b   :  { %679 = shalt.err (!%p676_p4)
}
  0x2c   :  { %s680_s14 = scalar_lea.vmem %s48_s18, 256  ;;  %p685_p6 = scmp.lt.s32.totalorder %s48_s18, %s48_s18 }
  0x2d   :  { %p681_p5 = scmp.ne.s32.totalorder %s48_s18, %s680_s14  ;;  %p686_p7 = scmp.lt.s32.totalorder %s680_s14, %s680_s14 }
  0x2f   :  { %p687_p8 = por %p686_p7, %p685_p6 }
  0x31   :  { %p688_p9 = pnand %p687_p8, %p681_p5 }
  0x33   :  { %691 = shalt.err (!%p688_p9)
}
  0x34   :  { %53 = dma.hbm_to_vmem [thread:$0]  %s925_s3, 256, %s48_s18, [#allocation6], %s769_s11, %s769_s11, %s770_s12  }
  0x35   :  { %s773_s16 = smov [#allocation8]   ;;  %s692_s21 = scalar_lea.hbm %s926_s4, 3072 }
  0x36   :  { %s59_s17 = sshll.u32 %s773_s16, 4  ;;  %p693_p10 = scmp.ne.s32.totalorder %s926_s4, %s692_s21  ;;  %s60_s17 = int_to_ptr.vmem [resolvable:$true] %s59_s17 }
  0x37   :  { %p696_p11 = scmp.lt.u32.totalorder %s692_s21, %s926_s4 }
  0x39   :  { %p698_p12 = pnand %p696_p11, %p693_p10 }
  0x3b   :  { %701 = shalt.err (!%p698_p12)
}
  0x3c   :  { %s702_s1 = scalar_lea.vmem %s60_s17, 3072  ;;  %p707_p0 = scmp.lt.s32.totalorder %s60_s17, %s60_s17 }
  0x3d   :  { %p703_p13 = scmp.ne.s32.totalorder %s60_s17, %s702_s1  ;;  %p708_p1 = scmp.lt.s32.totalorder %s702_s1, %s702_s1 }
  0x3f   :  { %p709_p2 = por %p708_p1, %p707_p0 }
  0x41   :  { %p710_p3 = pnand %p709_p2, %p703_p13 }
  0x43   :  { %713 = shalt.err (!%p710_p3)
}
  0x44   :  { %s774_s3 = smov 768   ;;  %s775_s18 = smov 48  }
  0x45   :  { %65 = dma.hbm_to_vmem [thread:$0]  %s926_s4, 3072, %s60_s17, [#allocation9], %s774_s3, %s774_s3, %s775_s18  }
  0x46   :  { %758 = dma.done.wait [#allocation3], 32  }
  0x47   :  { %759 = vsyncadd [#allocation3], 4294967264 }
  0x48   :  { %760 = dma.done.wait [#allocation6], 768  }
  0x49   :  { %761 = vsyncadd [#allocation6], 4294966528 }
  0x4a   :  { %762 = dma.done.wait [#allocation9], 3072  }
  0x4b   :  { %763 = vsyncadd [#allocation9], 4294964224  ;;  %v776_v0 = vmov 0.0|0.0   ;;  %vm777_vm0 = vmmov 0   ;;  %v778_v1 = vmov 0.0   ;;  %v88_v2 = vld [vmem:[#allocation5] sm:$0xff]  ;;  %v179_v50 = vlaneseq }
  0x4c   :  { %577 = vmatprep.subr.bf16.mxu0 %v776_v0  ;;  %574 = vmatprep.mubr.msk.f32.mxu0 %vm777_vm0, %v778_v1  ;;  %v89_v3 = vld [vmem:[#allocation5 + $0x8] sm:$0xff]  ;;  %v218_v4 = vld [vmem:[#allocation8 + $0x8] sm:$0xff]  ;;  %v217_v7 = vld [vmem:[#allocation8] sm:$0xff]  ;;  %vm99_vm1 = vcmask 261120   ;;  %v779_v52 = vmov 1966171168  }
  0x4d   :  { %337 = vmatprep.mubr.f32.mxu1 %v778_v1  ;;  %v578_v5 = vpack.c.bf16 %v89_v3, %v88_v2  ;;  %v224_v6 = vld [vmem:[#allocation8 + $0x38] sm:$0xff]  ;;  %v223_v8 = vld [vmem:[#allocation8 + $0x30] sm:$0xff]  ;;  %v90_v11 = vld [vmem:[#allocation5 + $0x10] sm:$0xff]  ;;  %v180_v51 = vshrl.u32 %v179_v50, 7  ;;  %v177_v53 = vunpack.c.l.s4 %v779_v52  ;;  %vm212_vm2 = vcmask 523264   ;;  %s782_s8 = smov [#allocation11]  }
  0x4e   :  { %v583_v9 = vpack.c.bf16 %v224_v6, %v218_v4  ;;  %v585_v10 = vpack.c.bf16 %v223_v8, %v217_v7  ;;  %v91_v12 = vld [vmem:[#allocation5 + $0x18] sm:$0xff]  ;;  %v236_v15 = vld [vmem:[#allocation8 + $0x98] sm:$0xff]  ;;  %v229_v16 = vld [vmem:[#allocation8 + $0x60] sm:$0xff]  ;;  %v780_v4 = vmov 1983009808   ;;  %s539_s9 = sshll.u32 %s782_s8, 4  ;;  %s540_s9 = int_to_ptr.vmem [resolvable:$true] %s539_s9 }
  0x4f   :  { %v230_v13 = vld [vmem:[#allocation8 + $0x68] sm:$0xff]  ;;  %579 = vmatpush3.bf16.msra.mxu0 %v578_v5  ;;  %v581_v14 = vpack.c.bf16 %v91_v12, %v90_v11  ;;  %v235_v17 = vld [vmem:[#allocation8 + $0x90] sm:$0xff]  ;;  %v220_v19 = vld [vmem:[#allocation8 + $0x18] sm:$0xff]  ;;  %v200_v54 = vsub.s32 0, %v180_v51  ;;  %v249_v56 = vsub.s32 1, %v180_v51  ;;  %v178_v57 = vunpack.c.0.s8 %v177_v53 }
  0x50   :  { %584 = vmatprep.subr.bf16.mxu1 %v583_v9  ;;  %580 = vmatprep.subr.bf16.mxu0 %v776_v0  ;;  %v587_v18 = vpack.c.bf16 %v236_v15, %v230_v13  ;;  %v226_v20 = vld [vmem:[#allocation8 + $0x48] sm:$0xff]  ;;  %v589_v22 = vpack.c.bf16 %v235_v17, %v229_v16  ;;  %v228_v26 = vld [vmem:[#allocation8 + $0x58] sm:$0xff]  ;;  %v219_v30 = vld [vmem:[#allocation8 + $0x10] sm:$0xff]  ;;  %v495_v5 = vunpack.c.l.s4 %v780_v4  ;;  %v253_v6 = vsub.s32 2, %v180_v51 }
  0x51   :  { %v80_v21 = vld [vmem:[#allocation2] sm:$0x3]  ;;  %586 = vmatpush1.bf16.msra.mxu1 %v585_v10  ;;  %v591_v23 = vpack.c.bf16 %v226_v20, %v220_v19  ;;  %v225_v31 = vld [vmem:[#allocation8 + $0x40] sm:$0xff]  ;;  %v227_v33 = vld [vmem:[#allocation8 + $0x50] sm:$0xff]  ;;  %v181_v61 = vsub.s32 %v178_v57, %v180_v51  ;;  %v257_v8 = vsub.s32 3, %v180_v51  ;;  %v261_v9 = vsub.s32 4, %v180_v51 }
  0x52   :  { %v554_v24 = vmul.f32 -1.442695, %v80_v21  ;;  %v222_v25 = vld [vmem:[#allocation8 + $0x28] sm:$0xff]  ;;  %588 = vmatprep.subr.bf16.mxu1 %v587_v18  ;;  %v221_v32 = vld [vmem:[#allocation8 + $0x20] sm:$0xff]  ;;  %v232_v34 = vld [vmem:[#allocation8 + $0x78] sm:$0xff]  ;;  %v593_v39 = vpack.c.bf16 %v225_v31, %v219_v30  ;;  %v265_v10 = vsub.s32 5, %v180_v51  ;;  %v496_v18 = vunpack.c.0.s8 %v495_v5 }
  0x53   :  { %582 = vmatpush3.bf16.msra.mxu0 %v581_v14  ;;  %v599_v27 = vpack.c.bf16 %v228_v26, %v222_v25  ;;  %v238_v35 = vld [vmem:[#allocation8 + $0xa8] sm:$0xff]  ;;  %v240_v37 = vld [vmem:[#allocation8 + $0xb8] sm:$0xff]  ;;  %v601_v40 = vpack.c.bf16 %v227_v33, %v221_v32  ;;  %v231_v41 = vld [vmem:[#allocation8 + $0x70] sm:$0xff] }
  0x54   :  { %622 = vpow2.f32 %v554_v24  ;;  %592 = vmatprep.subr.bf16.mxu0 %v591_v23  ;;  %v234_v36 = vld [vmem:[#allocation8 + $0x88] sm:$0xff]  ;;  %v595_v43 = vpack.c.bf16 %v238_v35, %v232_v34  ;;  %v237_v44 = vld [vmem:[#allocation8 + $0xa0] sm:$0xff]  ;;  %v239_v46 = vld [vmem:[#allocation8 + $0xb0] sm:$0xff]  ;;  %v499_v32 = vsub.s32 %v496_v18, %v180_v51 }
  0x55   :  { %590 = vmatpush1.bf16.msra.mxu1 %v589_v22  ;;  %v233_v45 = vld [vmem:[#allocation8 + $0x80] sm:$0xff]  ;;  %v603_v47 = vpack.c.bf16 %v240_v37, %v234_v36  ;;  %v597_v48 = vpack.c.bf16 %v237_v44, %v231_v41  ;;  %v173_v16 = vld [vmem:[#allocation7] sm:$0xff]  ;;  %v174_v17 = vld [vmem:[#allocation7 + $0x8] sm:$0xff] }
  0x56   :  { %600 = vmatprep.subr.bf16.mxu1 %v599_v27  ;;  %v605_v49 = vpack.c.bf16 %v239_v46, %v233_v45  ;;  %v241_v55 = vld [vmem:[%s927_s5] sm:$0x3f] }
  0x57   :  { %v246_v58 = vrot.slane %v241_v55, %v200_v54  ;;  %v555_v59 = vld [vmem:[%s924_s2] ss:$0 sm:$0xff]  ;;  %v250_v60 = vrot.slane %v241_v55, %v249_v56  ;;  %v254_v15 = vrot.slane %v241_v55, %v253_v6  ;;  %v258_v19 = vrot.slane %v241_v55, %v257_v8  ;;  %s781_s2 = smov [#allocation10]  }
  0x58   :  { %v262_v20 = vrot.slane %v241_v55, %v261_v9  ;;  %s526_s5 = sshll.u32 %s781_s2, 4  ;;  %s527_s5 = int_to_ptr.vmem [resolvable:$true] %s526_s5 }
  0x59   :  { %s714_s10 = scalar_lea.vmem %s527_s5, 512  ;;  %p719_p5 = scmp.lt.s32.totalorder %s527_s5, %s527_s5 }
  0x5a   :  { %p715_p4 = scmp.ne.s32.totalorder %s527_s5, %s714_s10  ;;  %p720_p6 = scmp.lt.s32.totalorder %s714_s10, %s714_s10 }
  0x5c   :  { %p721_p7 = por %p720_p6, %p719_p5 }
  0x5e   :  { %v623_v28 = vpop.eup %622  ;;  %p722_p8 = pnand %p721_p7, %p715_p4 }
  0x5f   :  { %v84_v29 = vadd.f32 1.0, %v623_v28 }
  0x61   :  { %624 = vrcp.f32 %v84_v29 }
  0x6b   :  { %v625_v38 = vpop.eup %624 }
  0x6c   :  { %v87_v42 = vmul.f32 %v625_v38, %v80_v21  ;;  %v266_v21 = vrot.slane %v241_v55, %v265_v10 }
  0x6e   :  { %575 = vmatmul.mubr.msk.f32.vlgmr.msra.gmra.mrb[0].mxu0 %vm99_vm1, %v87_v42  ;;  %557 = vmatmul.mubr.msk.f32.vlgmr.msra.gmra.mrb[0].mxu1 %vm99_vm1, %v87_v42 }
  0x6f   :  { %594 = vmatpush1.bf16.msra.mxu0 %v593_v39  ;;  %602 = vmatpush1.bf16.msra.mxu1 %v601_v40 }
  0x70   :  { %596 = vmatprep.subr.bf16.mxu0 %v595_v43  ;;  %408 = vmatprep.mubr.f32.mxu0 %v778_v1 }
  0x71   :  { %604 = vmatprep.subr.bf16.mxu1 %v603_v47  ;;  %479 = vmatprep.mubr.f32.mxu1 %v778_v1 }
  0x73   :  { %598 = vmatpush1.bf16.msra.mxu0 %v597_v48  ;;  %606 = vmatpush1.bf16.msra.mxu1 %v605_v49 }
  0x76   :  { %558 = vmatmul.mubr.msk.f32.vlgmr.msra.gmra.mrb[2].mxu0 %vm99_vm1, %v87_v42  ;;  %559 = vmatmul.mubr.msk.f32.vlgmr.msra.gmra.mrb[2].mxu1 %vm99_vm1, %v87_v42 }
 0x141   :  { %v169_v62 = vpop.f32.mrb[0].mxu0  ;;  %v339_v63 = vpop.f32.mrb[0].mxu1 }
 0x142   :  { %v170_v0 = vadd.f32 %v555_v59, %v169_v62  ;;  %v576_v1 = vpop.f32.mrb[1].mxu0  ;;  %v340_v2 = vadd.f32 %v339_v63, %v246_v58  ;;  %v341_v3 = vpop.f32.mrb[1].mxu1 }
 0x143   :  { %v342_v7 = vadd.f32 %v341_v3, %v250_v60 }
 0x144   :  { %v182_v11 = vrot.slane %v170_v0, %v181_v61 }
 0x145   :  { %v492_v12 = vcombine.low %v340_v2, %v342_v7 }
 0x146   :  { %v183_v13 = vcombine.high %v182_v11, %v182_v11  ;;  %v190_v14 = vrot.slane %v182_v11, %v181_v61 }
 0x147   :  { %v500_v40 = vrot.slane %v492_v12, %v499_v32 }
 0x148   :  { %v197_v22 = vrot.slane %v183_v13, %v181_v61  ;;  %v201_v23 = vrot.slane %v190_v14, %v200_v54 }
 0x149   :  { %v410_v24 = vpop.f32.mrb[2].mxu0  ;;  %v481_v25 = vpop.f32.mrb[2].mxu1 }
 0x14a   :  { %v205_v26 = vrot.slane %v197_v22, %v200_v54  ;;  %v208_v27 = vadd.f32 %v201_v23, %v173_v16  ;;  %v209_v28 = vadd.f32 %v201_v23, %v174_v17  ;;  %v411_v29 = vadd.f32 %v410_v24, %v254_v15  ;;  %v412_v30 = vpop.f32.mrb[3].mxu0  ;;  %v483_v31 = vpop.f32.mrb[3].mxu1 }
 0x14b   :  { %v413_v33 = vadd.f32 %v412_v30, %v258_v19  ;;  %v482_v34 = vadd.f32 %v481_v25, %v262_v20  ;;  %v484_v35 = vadd.f32 %v483_v31, %v266_v21 }
 0x14c   :  { %v210_v36 = vadd.f32 %v205_v26, %v173_v16  ;;  %v211_v37 = vadd.f32 %v205_v26, %v174_v17  ;;  %213 = vst.msk [vmem:[#allocation10] sm:$0xff] %vm212_vm2, %v208_v27  ;;  %214 = vst.msk [vmem:[#allocation10 + $0x8] sm:$0xff] %vm212_vm2, %v209_v28 }
 0x14d   :  { %v493_v38 = vcombine.low %v411_v29, %v413_v33  ;;  %v509_v39 = vcombine.low %v482_v34, %v484_v35 }
 0x14e   :  { %215 = vst.msk [vmem:[#allocation10 + $0x10] sm:$0xff] %vm212_vm2, %v210_v36  ;;  %216 = vst.msk [vmem:[#allocation10 + $0x18] sm:$0xff] %vm212_vm2, %v211_v37 }
 0x14f   :  { %v507_v41 = vrot.slane %v493_v38, %v499_v32  ;;  %560 = vst.sshfl [vmem:[#allocation11 + $0x8] sm:$0x33 pattern:$0x76325410] %v509_v39 }
 0x150   :  { %725 = shalt.err (!%p722_p8)
}
 0x151   :  { %s726_s0 = scalar_lea.hbm %s928_s6, 512 }
 0x152   :  { %p727_p9 = scmp.ne.s32.totalorder %s928_s6, %s726_s0  ;;  %p730_p10 = scmp.lt.u32.totalorder %s726_s0, %s928_s6 }
 0x154   :  { %p732_p11 = pnand %p730_p10, %p727_p9 }
 0x156   :  { %735 = shalt.err (!%p732_p11)
}
 0x157   :  { %532 = dma.vmem_to_hbm [thread:$0]  %s527_s5, 512, %s928_s6, [#allocation4], %s769_s11, %s769_s11, %s770_s12   ;;  %v508_v42 = vcombine.low %v500_v40, %v507_v41 }
 0x158   :  { %s736_s22 = scalar_lea.vmem %s540_s9, 192  ;;  %p741_p13 = scmp.lt.s32.totalorder %s540_s9, %s540_s9 }
 0x159   :  { %519 = vst [vmem:[#allocation11] sm:$0xff] %v508_v42  ;;  %p737_p12 = scmp.ne.s32.totalorder %s540_s9, %s736_s22  ;;  %p742_p0 = scmp.lt.s32.totalorder %s736_s22, %s736_s22 }
 0x15b   :  { %p743_p1 = por %p742_p0, %p741_p13 }
 0x15d   :  { %p744_p2 = pnand %p743_p1, %p737_p12 }
 0x15f   :  { %747 = shalt.err (!%p744_p2)
}
 0x160   :  { %s748_s26 = scalar_lea.hbm %s929_s7, 192 }
 0x161   :  { %p749_p3 = scmp.ne.s32.totalorder %s929_s7, %s748_s26  ;;  %p752_p4 = scmp.lt.u32.totalorder %s748_s26, %s929_s7 }
 0x163   :  { %p754_p5 = pnand %p752_p4, %p749_p3 }
 0x165   :  { %757 = shalt.err (!%p754_p5)
}
 0x166   :  { %542 = dma.vmem_to_hbm [thread:$0]  %s540_s9, 192, %s929_s7, [#allocation12]  }
 0x167   :  { %764 = dma.done.wait [#allocation4], 512  }
 0x168   :  { %765 = vsyncadd [#allocation4], 4294966784 }
 0x169   :  { %766 = dma.done.wait [#allocation12], 192  }
 0x16a   :  { %767 = vsyncadd [#allocation12], 4294967104 }
 0x16b   :  { %549 = vsyncpa [#allocation3], 1 }
 0x16c   :  { %550 = vsyncpa [#allocation6], 1 }
 0x16d   :  { %551 = vsyncpa [#allocation9], 1 }
 0x16e   :  { %552 = vsyncpa [#allocation4], 1 }
 0x16f   :  { %553 = vsyncpa [#allocation12], 1 }

</bundles_post_ra>
